<compile_context>
chip_gen: v7x
topology: tpu7x:2x2x1
jax: 0.10.0
libtpu: 0.0.40
codegen_flags: <defaults>
</compile_context>

<pallas_src>
import functools

import jax
import jax.numpy as jnp
from jax.experimental import pallas as pl
from jax.experimental.pallas import tpu as pltpu

_LANE = 128


def _mlp_kernel(x_ref, w1_ref, b1_ref, w2_ref, b2_ref,
                w3_ref, b3_ref, w4_ref, b4_ref, o_ref, *, mm_dtype):
    """Fused 4x (W @ h + b) with tanh between layers, on one batch tile.

    Batch lives on the LANE axis: x_ref (d0, tile_b), o_ref (d4, tile_b),
    weights (out, in) (PyTorch nn.Linear layout), biases (out, 1).  All adds,
    tanh and the final store are lane-dense.  Matmuls run in mm_dtype (bf16 by
    default, cast in-kernel) with f32 accumulation; bias add + tanh stay f32.
    """
    def matmul(w_ref, h):
        w = w_ref[...]
        if mm_dtype is not None:
            w = w.astype(mm_dtype)
            h = h.astype(mm_dtype)
        return jnp.dot(w, h, preferred_element_type=jnp.float32)

    h = jnp.tanh(matmul(w1_ref, x_ref[...]) + b1_ref[...])
    h = jnp.tanh(matmul(w2_ref, h) + b2_ref[...])
    h = jnp.tanh(matmul(w3_ref, h) + b3_ref[...])
    o_ref[...] = (matmul(w4_ref, h) + b4_ref[...]).astype(o_ref.dtype)


@functools.partial(jax.jit, static_argnames=("max_tile_b", "matmul_dtype"))
def net4_forward(x, params, max_tile_b=2048, matmul_dtype=jnp.bfloat16):
    """x: (B, layer_sizes[0]) float32 -> (B, layer_sizes[-1]) float32.

    params: (w1, b1, w2, b2, w3, b3, w4, b4) with w_i of shape (out, in)
    (PyTorch nn.Linear layout) and b_i of shape (out,).
    """
    (w1, b1, w2, b2, w3, b3, w4, b4) = params
    B, d0 = x.shape
    d4 = w4.shape[0]

    # ---- batch tile ------------------------------------------------------
    max_tile_b = max(_LANE, (int(max_tile_b) // _LANE) * _LANE)
    # ~B/2 rounded up to a lane multiple: any B > 128 gives >= 2 grid steps on
    # the "parallel" axis (v7x dual TensorCores), capped at max_tile_b so big
    # batches still get wide tiles.  No padding: last block may be partial.
    tile_b = min(max_tile_b, max(_LANE, pl.cdiv(B, 2 * _LANE) * _LANE))
    grid = (pl.cdiv(B, tile_b),)

    # ---- single fused wrapper pass on x: transpose + cast ------------------
    xt = jnp.transpose(x)                       # (d0, B), batch on lanes
    if matmul_dtype is not None:
        xt = xt.astype(matmul_dtype)            # fuses with the transpose
    # Biases as (out, 1) so they broadcast along the lane (batch) axis;
    # reshape of a contiguous vector is free (no data movement).
    b1, b2, b3, b4 = (b.reshape(-1, 1) for b in (b1, b2, b3, b4))

    def resident(arr):
        # Whole (tiny) array in VMEM with a constant block index, so Pallas
        # keeps it resident across grid steps instead of re-DMAing it.
        return pl.BlockSpec(arr.shape, lambda i: (0, 0))

    kernel = functools.partial(_mlp_kernel, mm_dtype=matmul_dtype)

    out_t = pl.pallas_call(
        kernel,
        out_shape=jax.ShapeDtypeStruct((d4, B), x.dtype),
        grid_spec=pltpu.PrefetchScalarGridSpec(
            num_scalar_prefetch=0,
            grid=grid,
            in_specs=[
                pl.BlockSpec((d0, tile_b), lambda i: (0, i)),
                resident(w1), resident(b1),
                resident(w2), resident(b2),
                resident(w3), resident(b3),
                resident(w4), resident(b4),
            ],
            out_specs=pl.BlockSpec((d4, tile_b), lambda i: (0, i)),
        ),
        compiler_params=pltpu.CompilerParams(
            dimension_semantics=("parallel",)),
    )(xt, w1, b1, w2, b2, w3, b3, w4, b4)

    # Tiny (d4, B) -> (B, d4) layout fix-up (PyTorch-facing output layout).
    return jnp.transpose(out_t)


def init_net4_params(key, layer_sizes, dtype=jnp.float32):
    """PyTorch nn.Linear default init: U(-1/sqrt(fan_in), 1/sqrt(fan_in)).
    Weights stored (out, in), biases (out,) -- identical to nn.Linear."""
    params = []
    for li in range(4):
        fan_in, fan_out = layer_sizes[li], layer_sizes[li + 1]
        key, kw, kb = jax.random.split(key, 3)
        bound = 1.0 / (float(fan_in) ** 0.5)
        w = jax.random.uniform(kw, (fan_out, fan_in), dtype,
                               minval=-bound, maxval=bound)
        b = jax.random.uniform(kb, (fan_out,), dtype,
                               minval=-bound, maxval=bound)
        params += [w, b]
    return tuple(params)


def net4_reference(x, params):
    """Pure-JAX f32 reference matching the PyTorch forward."""
    (w1, b1, w2, b2, w3, b3, w4, b4) = params
    h = jnp.tanh(x @ w1.T + b1)
    h = jnp.tanh(h @ w2.T + b2)
    h = jnp.tanh(h @ w3.T + b3)
    return h @ w4.T + b4


if __name__ == "__main__":
    # Small shapes consistent with Net4(layer_sizes=[4, 32, 32, 32, 2]).
    layer_sizes = (4, 32, 32, 32, 2)

    key = jax.random.PRNGKey(0)
    key, kx_small, kx_odd = jax.random.split(key, 3)
    params = init_net4_params(key, layer_sizes)

    # B=16: single (partial) block, collapses to one grid step.
    x_small = jax.random.normal(kx_small, (16, layer_sizes[0]), jnp.float32)
    # B=300: tile_b=256 -> 2 grid steps with a masked partial last block,
    # exercising the "no explicit pad" path flagged by the review.
    x_odd = jax.random.normal(kx_odd, (300, layer_sizes[0]), jnp.float32)

    for x in (x_small, x_odd):
        ref = net4_reference(x, params)

        # Pure-f32 path: must match the reference tightly (structure +
        # partial-block correctness).
        out_f32 = jax.block_until_ready(
            net4_forward(x, params, matmul_dtype=None))
        assert out_f32.shape == ref.shape
        assert jnp.allclose(out_f32, ref, atol=1e-5, rtol=1e-5), \
            f"f32 kernel mismatch vs reference (B={x.shape[0]})"

        # Default perf path: bf16 MXU operands, f32 accumulation/bias/tanh.
        out = jax.block_until_ready(net4_forward(x, params))
        assert out.shape == ref.shape
        assert jnp.allclose(out, ref, atol=2e-2, rtol=2e-2), \
            f"bf16-matmul kernel mismatch vs reference (B={x.shape[0]})"

    print("KERNEL_OK")
</pallas_src>

<mosaic_0001>
module attributes {stable_mosaic.version = 11 : i64} {
  func.func @_mlp_kernel(%arg0: i32, %arg1: memref<4x128xf32, #tpu.memory_space<vmem>>, %arg2: memref<32x4xf32, #tpu.memory_space<vmem>>, %arg3: memref<32x1xf32, #tpu.memory_space<vmem>>, %arg4: memref<32x32xf32, #tpu.memory_space<vmem>>, %arg5: memref<32x1xf32, #tpu.memory_space<vmem>>, %arg6: memref<32x32xf32, #tpu.memory_space<vmem>>, %arg7: memref<32x1xf32, #tpu.memory_space<vmem>>, %arg8: memref<2x32xf32, #tpu.memory_space<vmem>>, %arg9: memref<2x1xf32, #tpu.memory_space<vmem>>, %arg10: memref<2x128xf32, #tpu.memory_space<vmem>>) attributes {dimension_semantics = [#tpu.dimension_semantics<parallel>], iteration_bounds = array<i64: 1>, scalar_prefetch = 0 : i64, scratch_operands = 0 : i64, tpu.core_type = #tpu.core_type<tc>, window_params = [{transform_indices = @transform_0, window_bounds = array<i64: 4, 128>}, {pipeline_mode = #tpu.pipeline_mode<synchronous>, transform_indices = @transform_1, window_bounds = array<i64: 32, 4>}, {pipeline_mode = #tpu.pipeline_mode<synchronous>, transform_indices = @transform_2, window_bounds = array<i64: 32, 1>}, {pipeline_mode = #tpu.pipeline_mode<synchronous>, transform_indices = @transform_3, window_bounds = array<i64: 32, 32>}, {pipeline_mode = #tpu.pipeline_mode<synchronous>, transform_indices = @transform_4, window_bounds = array<i64: 32, 1>}, {pipeline_mode = #tpu.pipeline_mode<synchronous>, transform_indices = @transform_5, window_bounds = array<i64: 32, 32>}, {pipeline_mode = #tpu.pipeline_mode<synchronous>, transform_indices = @transform_6, window_bounds = array<i64: 32, 1>}, {pipeline_mode = #tpu.pipeline_mode<synchronous>, transform_indices = @transform_7, window_bounds = array<i64: 2, 32>}, {pipeline_mode = #tpu.pipeline_mode<synchronous>, transform_indices = @transform_8, window_bounds = array<i64: 2, 1>}, {transform_indices = @transform_9, window_bounds = array<i64: 2, 128>}]} {
    %c0 = arith.constant 0 : index
    %c0_0 = arith.constant 0 : index
    %0 = vector.load %arg1[%c0, %c0_0] : memref<4x128xf32, #tpu.memory_space<vmem>>, vector<4x128xf32>
    %c0_1 = arith.constant 0 : index
    %c0_2 = arith.constant 0 : index
    %1 = vector.load %arg2[%c0_1, %c0_2] : memref<32x4xf32, #tpu.memory_space<vmem>>, vector<32x4xf32>
    %cst = arith.constant dense<0.000000e+00> : vector<32x128xf32>
    %2 = tpu.matmul %1, %0, %cst {dimension_numbers = #tpu.dot_dimension_numbers<[1], [0], [0], [1], [0, 0, 1, 1], [], []>} : vector<32x4xf32>, vector<4x128xf32>, vector<32x128xf32> -> vector<32x128xf32>
    %c0_3 = arith.constant 0 : index
    %c0_4 = arith.constant 0 : index
    %3 = vector.load %arg3[%c0_3, %c0_4] : memref<32x1xf32, #tpu.memory_space<vmem>>, vector<32x1xf32>
    %4 = vector.broadcast %3 : vector<32x1xf32> to vector<32x128xf32>
    %5 = arith.addf %2, %4 : vector<32x128xf32>
    %6 = math.tanh %5 : vector<32x128xf32>
    %c0_5 = arith.constant 0 : index
    %c0_6 = arith.constant 0 : index
    %7 = vector.load %arg4[%c0_5, %c0_6] : memref<32x32xf32, #tpu.memory_space<vmem>>, vector<32x32xf32>
    %cst_7 = arith.constant dense<0.000000e+00> : vector<32x128xf32>
    %8 = tpu.matmul %7, %6, %cst_7 {dimension_numbers = #tpu.dot_dimension_numbers<[1], [0], [0], [1], [0, 0, 1, 1], [], []>} : vector<32x32xf32>, vector<32x128xf32>, vector<32x128xf32> -> vector<32x128xf32>
    %c0_8 = arith.constant 0 : index
    %c0_9 = arith.constant 0 : index
    %9 = vector.load %arg5[%c0_8, %c0_9] : memref<32x1xf32, #tpu.memory_space<vmem>>, vector<32x1xf32>
    %10 = vector.broadcast %9 : vector<32x1xf32> to vector<32x128xf32>
    %11 = arith.addf %8, %10 : vector<32x128xf32>
    %12 = math.tanh %11 : vector<32x128xf32>
    %c0_10 = arith.constant 0 : index
    %c0_11 = arith.constant 0 : index
    %13 = vector.load %arg6[%c0_10, %c0_11] : memref<32x32xf32, #tpu.memory_space<vmem>>, vector<32x32xf32>
    %cst_12 = arith.constant dense<0.000000e+00> : vector<32x128xf32>
    %14 = tpu.matmul %13, %12, %cst_12 {dimension_numbers = #tpu.dot_dimension_numbers<[1], [0], [0], [1], [0, 0, 1, 1], [], []>} : vector<32x32xf32>, vector<32x128xf32>, vector<32x128xf32> -> vector<32x128xf32>
    %c0_13 = arith.constant 0 : index
    %c0_14 = arith.constant 0 : index
    %15 = vector.load %arg7[%c0_13, %c0_14] : memref<32x1xf32, #tpu.memory_space<vmem>>, vector<32x1xf32>
    %16 = vector.broadcast %15 : vector<32x1xf32> to vector<32x128xf32>
    %17 = arith.addf %14, %16 : vector<32x128xf32>
    %18 = math.tanh %17 : vector<32x128xf32>
    %c0_15 = arith.constant 0 : index
    %c0_16 = arith.constant 0 : index
    %19 = vector.load %arg8[%c0_15, %c0_16] : memref<2x32xf32, #tpu.memory_space<vmem>>, vector<2x32xf32>
    %cst_17 = arith.constant dense<0.000000e+00> : vector<2x128xf32>
    %20 = tpu.matmul %19, %18, %cst_17 {dimension_numbers = #tpu.dot_dimension_numbers<[1], [0], [0], [1], [0, 0, 1, 1], [], []>} : vector<2x32xf32>, vector<32x128xf32>, vector<2x128xf32> -> vector<2x128xf32>
    %c0_18 = arith.constant 0 : index
    %c0_19 = arith.constant 0 : index
    %21 = vector.load %arg9[%c0_18, %c0_19] : memref<2x1xf32, #tpu.memory_space<vmem>>, vector<2x1xf32>
    %22 = vector.broadcast %21 : vector<2x1xf32> to vector<2x128xf32>
    %23 = arith.addf %20, %22 : vector<2x128xf32>
    %c0_20 = arith.constant 0 : index
    %c0_21 = arith.constant 0 : index
    %24 = vector.load %arg10[%c0_20, %c0_21] : memref<2x128xf32, #tpu.memory_space<vmem>>, vector<2x128xf32>
    tpu.vector_store %arg10[%c0_20, %c0_21], %23 {strides = array<i32>} : memref<2x128xf32, #tpu.memory_space<vmem>>, vector<2x128xf32>,
    return
  }
  func.func @transform_0(%arg0: i32) -> (i32, i32) {
    %c0_i32 = arith.constant 0 : i32
    %c0_i32_0 = arith.constant 0 : i32
    return %c0_i32, %arg0 : i32, i32
  }
  func.func @transform_1(%arg0: i32) -> (i32, i32) {
    %c0_i32 = arith.constant 0 : i32
    %c0_i32_0 = arith.constant 0 : i32
    %c0_i32_1 = arith.constant 0 : i32
    return %c0_i32, %c0_i32_0 : i32, i32
  }
  func.func @transform_2(%arg0: i32) -> (i32, i32) {
    %c0_i32 = arith.constant 0 : i32
    %c0_i32_0 = arith.constant 0 : i32
    %c0_i32_1 = arith.constant 0 : i32
    return %c0_i32, %c0_i32_0 : i32, i32
  }
  func.func @transform_3(%arg0: i32) -> (i32, i32) {
    %c0_i32 = arith.constant 0 : i32
    %c0_i32_0 = arith.constant 0 : i32
    %c0_i32_1 = arith.constant 0 : i32
    return %c0_i32, %c0_i32_0 : i32, i32
  }
  func.func @transform_4(%arg0: i32) -> (i32, i32) {
    %c0_i32 = arith.constant 0 : i32
    %c0_i32_0 = arith.constant 0 : i32
    %c0_i32_1 = arith.constant 0 : i32
    return %c0_i32, %c0_i32_0 : i32, i32
  }
  func.func @transform_5(%arg0: i32) -> (i32, i32) {
    %c0_i32 = arith.constant 0 : i32
    %c0_i32_0 = arith.constant 0 : i32
    %c0_i32_1 = arith.constant 0 : i32
    return %c0_i32, %c0_i32_0 : i32, i32
  }
  func.func @transform_6(%arg0: i32) -> (i32, i32) {
    %c0_i32 = arith.constant 0 : i32
    %c0_i32_0 = arith.constant 0 : i32
    %c0_i32_1 = arith.constant 0 : i32
    return %c0_i32, %c0_i32_0 : i32, i32
  }
  func.func @transform_7(%arg0: i32) -> (i32, i32) {
    %c0_i32 = arith.constant 0 : i32
    %c0_i32_0 = arith.constant 0 : i32
    %c0_i32_1 = arith.constant 0 : i32
    return %c0_i32, %c0_i32_0 : i32, i32
  }
  func.func @transform_8(%arg0: i32) -> (i32, i32) {
    %c0_i32 = arith.constant 0 : i32
    %c0_i32_0 = arith.constant 0 : i32
    %c0_i32_1 = arith.constant 0 : i32
    return %c0_i32, %c0_i32_0 : i32, i32
  }
  func.func @transform_9(%arg0: i32) -> (i32, i32) {
    %c0_i32 = arith.constant 0 : i32
    %c0_i32_0 = arith.constant 0 : i32
    return %c0_i32, %arg0 : i32, i32
  }
}

</mosaic_0001>

<bundles_post_ra>
// kernel: net4_forward.1
= control target key start
LH: loop header
LB: loop body
LE: loop exit
PB: predicated region body
PF: predicated region fallthrough
CT: control target
= control target key end

     0   :  { %vm75_vm0 = vcmask 1043456   ;;  %vm62_vm1 = vcmask 31744   ;;  %v686_v5 = vmov 0   ;;  %s847_s0 = inlined_call_operand.vmem [shape: f32[4,16], index: 0, kind: input, shape index: {}]   ;;  %s848_s1 = inlined_call_operand.vmem [shape: f32[32,4], index: 1, kind: input, shape index: {}]   ;;  %s849_s2 = inlined_call_operand.vmem [shape: f32[32,1], index: 2, kind: input, shape index: {}]   ;;  %s850_s3 = inlined_call_operand.vmem [shape: f32[32,32], index: 3, kind: input, shape index: {}]   ;;  %s851_s4 = inlined_call_operand.vmem [shape: f32[32,1], index: 4, kind: input, shape index: {}]   ;;  %s852_s5 = inlined_call_operand.vmem [shape: f32[32,32], index: 5, kind: input, shape index: {}]   ;;  %s853_s6 = inlined_call_operand.vmem [shape: f32[32,1], index: 6, kind: input, shape index: {}]   ;;  %s854_s7 = inlined_call_operand.vmem [shape: f32[2,32], index: 7, kind: input, shape index: {}]   ;;  %s855_s8 = inlined_call_operand.vmem [shape: f32[2,1], index: 8, kind: input, shape index: {}]   ;;  %s856_s9 = inlined_call_operand.hbm [shape: f32[2,16], index: 9, kind: output, shape index: {}]  }
   0x1   :  { %v33_v0 = vld [vmem:[%s847_s0] sm:$0xf]  ;;  %v35_v2 = vld [vmem:[%s848_s1 + $0x8] sm:$0xff]  ;;  %v36_v3 = vld [vmem:[%s848_s1 + $0x10] sm:$0xff]  ;;  %636 = vset.pattern.permute.xlu0 %v686_v5  ;;  %637 = vset.pattern.permute.xlu1 %v686_v5 }
   0x2   :  { %v34_v1 = vld [vmem:[%s848_s1] sm:$0xff]  ;;  %562 = vmatprep.subr.msk.mxu0 %vm75_vm0, %v33_v0  ;;  %v40_v6 = vld [vmem:[%s849_s2 + $0x10] sm:$0xff]  ;;  %v37_v7 = vld [vmem:[%s848_s1 + $0x18] sm:$0xff] }
   0x3   :  { %564 = vmatprep.mubr.msk.f32.mxu0 %vm62_vm1, %v34_v1  ;;  %v38_v4 = vld [vmem:[%s849_s2] sm:$0xff]  ;;  %563 = vmatpush3.msk.msra.mxu0 %vm75_vm0, %v33_v0  ;;  %v39_v8 = vld [vmem:[%s849_s2 + $0x8] sm:$0xff]  ;;  %v41_v9 = vld [vmem:[%s849_s2 + $0x18] sm:$0xff] }
   0x4   :  { %565 = vmatmul.mubr.msk.f32.vlgmr.msra.gmra.mrb[0].mxu0 %vm62_vm1, %v35_v2  ;;  %44 = vperm.xlu0 %636, %v38_v4  }
   0x5   :  { %567 = vmatprep.mubr.msk.f32.mxu0 %vm62_vm1, %v36_v3  ;;  %54 = vperm.xlu1 %637, %v40_v6  }
   0x6   :  { %14 = vsyncpa [#allocation3], 0  ;;  %v172_v10 = vld [vmem:[%s851_s4] sm:$0xff]  ;;  %v173_v11 = vld [vmem:[%s851_s4 + $0x8] sm:$0xff]  ;;  %vm196_vm2 = vcmask 261120   ;;  %v687_v63 = vmov 0.0|0.0  }
   0x7   :  { %v174_v12 = vld [vmem:[%s851_s4 + $0x10] sm:$0xff]  ;;  %v175_v13 = vld [vmem:[%s851_s4 + $0x18] sm:$0xff]  ;;  %v302_v14 = vld [vmem:[%s853_s6] sm:$0xff]  ;;  %vm688_vm3 = vmmov 0   ;;  %v689_v0 = vmov 0.0   ;;  %s690_s10 = smov [#allocation2]  }
   0x8   :  { %568 = vmatmul.mubr.msk.f32.gmra.mrb[2].mxu0 %vm62_vm1, %v37_v7  ;;  %49 = vperm.xlu0 %636, %v39_v8   ;;  %v303_v15 = vld [vmem:[%s853_s6 + $0x8] sm:$0xff]  ;;  %v304_v16 = vld [vmem:[%s853_s6 + $0x10] sm:$0xff]  ;;  %v305_v17 = vld [vmem:[%s853_s6 + $0x18] sm:$0xff]  ;;  %s514_s11 = sshll.u32 %s690_s10, 4  ;;  %s515_s11 = int_to_ptr.vmem [resolvable:$true] %s514_s11 }
   0x9   :  { %59 = vperm.xlu1 %637, %v41_v9   ;;  %v428_v18 = vld [vmem:[%s855_s8] sm:$0x3]  ;;  %v169_v38 = vld [vmem:[%s850_s3 + $0x8] sm:$0xff]  ;;  %v170_v39 = vld [vmem:[%s850_s3 + $0x10] sm:$0xff]  ;;  %s662_s12 = scalar_lea.vmem %s515_s11, 32  ;;  %p667_p1 = scmp.lt.s32.totalorder %s515_s11, %s515_s11 }
   0xa   :  { %v168_v19 = vld [vmem:[%s850_s3] sm:$0xff]  ;;  %v171_v40 = vld [vmem:[%s850_s3 + $0x18] sm:$0xff]  ;;  %v299_v60 = vld [vmem:[%s852_s5 + $0x8] sm:$0xff]  ;;  %p663_p0 = scmp.ne.s32.totalorder %s515_s11, %s662_s12  ;;  %p668_p2 = scmp.lt.s32.totalorder %s662_s12, %s662_s12 }
   0xb   :  { %578 = vmatprep.mubr.msk.f32.mxu1 %vm196_vm2, %v168_v19  ;;  %v298_v41 = vld [vmem:[%s852_s5] sm:$0xff]  ;;  %v300_v61 = vld [vmem:[%s852_s5 + $0x10] sm:$0xff]  ;;  %v301_v62 = vld [vmem:[%s852_s5 + $0x18] sm:$0xff] }
   0xc   :  { %178 = vperm.xlu0 %636, %v172_v10   ;;  %592 = vmatprep.mubr.msk.f32.mxu0 %vm196_vm2, %v298_v41  ;;  %v427_v19 = vld [vmem:[%s854_s7] sm:$0x3]  ;;  %p669_p3 = por %p668_p2, %p667_p1 }
   0xd   :  { %183 = vperm.xlu1 %637, %v173_v11  }
   0xe   :  { %p670_p4 = pnand %p669_p3, %p663_p0 }
  0x10   :  { %188 = vperm.xlu0 %636, %v174_v12  }
  0x11   :  { %193 = vperm.xlu1 %637, %v175_v13  }
  0x14   :  { %308 = vperm.xlu0 %636, %v302_v14  }
  0x15   :  { %313 = vperm.xlu1 %637, %v303_v15  }
  0x18   :  { %318 = vperm.xlu0 %636, %v304_v16  }
  0x19   :  { %323 = vperm.xlu1 %637, %v305_v17  }
  0x1c   :  { %431 = vperm.xlu0 %636, %v428_v18  }
  0x83   :  { %v45_v20 = vpop.permute.xlu0 %44 }
  0x84   :  { %v55_v21 = vpop.permute.xlu1 %54 }
  0x87   :  { %v50_v22 = vpop.permute.xlu0 %49 }
  0x88   :  { %v60_v27 = vpop.permute.xlu1 %59 }
  0x8b   :  { %v179_v43 = vpop.permute.xlu0 %178 }
  0x8c   :  { %v184_v42 = vpop.permute.xlu1 %183 }
  0x8f   :  { %v189_v50 = vpop.permute.xlu0 %188 }
  0x90   :  { %v194_v48 = vpop.permute.xlu1 %193 }
  0x93   :  { %v309_v2 = vpop.permute.xlu0 %308 }
  0x94   :  { %v314_v1 = vpop.permute.xlu1 %313 }
  0x97   :  { %v319_v9 = vpop.permute.xlu0 %318 }
  0x98   :  { %v324_v7 = vpop.permute.xlu1 %323 }
  0xd7   :  { %v566_v23 = vpop.f32.mrb[0].mxu0 }
  0xd8   :  { %v151_v24 = vadd.f32 %v566_v23, %v50_v22  ;;  %v145_v25 = vpop.f32.mrb[1].mxu0 }
  0xd9   :  { %v146_v26 = vadd.f32 %v145_v25, %v45_v20  ;;  %v432_v20 = vpop.permute.xlu0 %431 }
  0xda   :  { %638 = vtanh.f32 %v151_v24 }
  0xdb   :  { %640 = vtanh.f32 %v146_v26  ;;  %v569_v28 = vpop.f32.mrb[2].mxu0 }
  0xdc   :  { %v161_v29 = vadd.f32 %v569_v28, %v60_v27  ;;  %v155_v30 = vpop.f32.mrb[3].mxu0 }
  0xdd   :  { %v156_v31 = vadd.f32 %v155_v30, %v55_v21 }
  0xde   :  { %642 = vtanh.f32 %v161_v29 }
  0xdf   :  { %644 = vtanh.f32 %v156_v31 }
  0xe4   :  { %v639_v32 = vpop.eup %638 }
  0xe5   :  { %v641_v33 = vpop.eup %640 }
  0xe6   :  { %v609_v34 = vpack.c.bf16 %v639_v32, %v641_v33 }
  0xe8   :  { %v643_v35 = vpop.eup %642  ;;  %610 = vmatprep.subr.bf16.mxu1 %v609_v34 }
  0xe9   :  { %v645_v36 = vpop.eup %644  ;;  %612 = vmatpush3.bf16.msra.mxu1 %v609_v34 }
  0xea   :  { %v613_v37 = vpack.c.bf16 %v643_v35, %v645_v36 }
  0xec   :  { %614 = vmatprep.subr.bf16.mxu1 %v613_v37 }
  0xed   :  { %616 = vmatpush3.bf16.msra.mxu1 %v613_v37 }
  0xee   :  { %625 = vmatprep.subr.bf16.mxu1 %v687_v63 }
  0xf0   :  { %579 = vmatmul.mubr.msk.f32.vlgmr.msra.gmra.mrb[0].mxu1 %vm196_vm2, %v169_v38 }
  0xf1   :  { %581 = vmatprep.mubr.msk.f32.mxu1 %vm196_vm2, %v170_v39 }
  0xf4   :  { %582 = vmatmul.mubr.msk.f32.gmra.mrb[2].mxu1 %vm196_vm2, %v171_v40 }
  0xf5   :  { %606 = vmatprep.mubr.msk.f32.mxu1 %vm688_vm3, %v689_v0 }
 0x1c3   :  { %v580_v44 = vpop.f32.mrb[0].mxu1 }
 0x1c4   :  { %v281_v45 = vadd.f32 %v580_v44, %v184_v42  ;;  %v275_v46 = vpop.f32.mrb[1].mxu1 }
 0x1c5   :  { %v276_v47 = vadd.f32 %v275_v46, %v179_v43 }
 0x1c6   :  { %646 = vtanh.f32 %v281_v45 }
 0x1c7   :  { %648 = vtanh.f32 %v276_v47  ;;  %v583_v49 = vpop.f32.mrb[2].mxu1 }
 0x1c8   :  { %v291_v51 = vadd.f32 %v583_v49, %v194_v48  ;;  %v285_v52 = vpop.f32.mrb[3].mxu1 }
 0x1c9   :  { %v286_v53 = vadd.f32 %v285_v52, %v189_v50 }
 0x1ca   :  { %650 = vtanh.f32 %v291_v51 }
 0x1cb   :  { %652 = vtanh.f32 %v286_v53 }
 0x1d0   :  { %v647_v54 = vpop.eup %646 }
 0x1d1   :  { %v649_v55 = vpop.eup %648 }
 0x1d2   :  { %v617_v56 = vpack.c.bf16 %v647_v54, %v649_v55 }
 0x1d4   :  { %v651_v57 = vpop.eup %650  ;;  %618 = vmatprep.subr.bf16.mxu0 %v617_v56 }
 0x1d5   :  { %v653_v58 = vpop.eup %652  ;;  %620 = vmatpush3.bf16.msra.mxu0 %v617_v56 }
 0x1d6   :  { %v621_v59 = vpack.c.bf16 %v651_v57, %v653_v58 }
 0x1d8   :  { %622 = vmatprep.subr.bf16.mxu0 %v621_v59 }
 0x1d9   :  { %624 = vmatpush3.bf16.msra.mxu0 %v621_v59 }
 0x1dc   :  { %593 = vmatmul.mubr.msk.f32.vlgmr.msra.gmra.mrb[4].mxu0 %vm196_vm2, %v299_v60 }
 0x1dd   :  { %595 = vmatprep.mubr.msk.f32.mxu0 %vm196_vm2, %v300_v61 }
 0x1e0   :  { %596 = vmatmul.mubr.msk.f32.gmra.mrb[6].mxu0 %vm196_vm2, %v301_v62 }
 0x2af   :  { %v594_v3 = vpop.f32.mrb[4].mxu0 }
 0x2b0   :  { %v410_v4 = vadd.f32 %v594_v3, %v314_v1  ;;  %v404_v5 = vpop.f32.mrb[5].mxu0 }
 0x2b1   :  { %v405_v6 = vadd.f32 %v404_v5, %v309_v2 }
 0x2b2   :  { %654 = vtanh.f32 %v410_v4 }
 0x2b3   :  { %656 = vtanh.f32 %v405_v6  ;;  %v597_v8 = vpop.f32.mrb[6].mxu0 }
 0x2b4   :  { %v420_v10 = vadd.f32 %v597_v8, %v324_v7  ;;  %v414_v11 = vpop.f32.mrb[7].mxu0 }
 0x2b5   :  { %v415_v12 = vadd.f32 %v414_v11, %v319_v9 }
 0x2b6   :  { %658 = vtanh.f32 %v420_v10 }
 0x2b7   :  { %660 = vtanh.f32 %v415_v12 }
 0x2bc   :  { %v655_v13 = vpop.eup %654 }
 0x2bd   :  { %v657_v14 = vpop.eup %656 }
 0x2be   :  { %v626_v15 = vpack.c.bf16 %v655_v13, %v657_v14 }
 0x2c0   :  { %v659_v16 = vpop.eup %658  ;;  %627 = vmatpush3.bf16.msra.mxu1 %v626_v15 }
 0x2c1   :  { %v661_v17 = vpop.eup %660  ;;  %628 = vmatprep.subr.bf16.mxu1 %v687_v63 }
 0x2c2   :  { %v629_v18 = vpack.c.bf16 %v659_v16, %v661_v17 }
 0x2c4   :  { %630 = vmatpush3.bf16.msra.mxu1 %v629_v18 }
 0x2c7   :  { %607 = vmatmul.mubr.msk.f32.vlgmr.msra.gmra.mrb[4].mxu1 %vm196_vm2, %v427_v19 }
 0x39a   :  { %v503_v21 = vpop.f32.mrb[4].mxu1 }
 0x39b   :  { %v504_v22 = vadd.f32 %v503_v21, %v432_v20  ;;  %v608_v23 = vpop.f32.mrb[5].mxu1 }
 0x39d   :  { %507 = vst [vmem:[#allocation2] sm:$0x3] %v504_v22 }
 0x39e   :  { %673 = shalt.err (!%p670_p4)
}
 0x39f   :  { %s674_s7 = scalar_lea.hbm %s856_s9, 32 }
 0x3a0   :  { %p675_p5 = scmp.ne.s32.totalorder %s856_s9, %s674_s7  ;;  %p678_p6 = scmp.lt.u32.totalorder %s674_s7, %s856_s9 }
 0x3a2   :  { %p680_p7 = pnand %p678_p6, %p675_p5 }
 0x3a4   :  { %683 = shalt.err (!%p680_p7)
}
 0x3a5   :  { %517 = dma.vmem_to_hbm [thread:$0]  %s515_s11, 32, %s856_s9, [#allocation3]  }
 0x3a6   :  { %684 = dma.done.wait [#allocation3], 32  }
 0x3a7   :  { %685 = vsyncadd [#allocation3], 4294967264 }
 0x3a8   :  { %521 = vsyncpa [#allocation3], 1 }

</bundles_post_ra>
